<compile_context>
chip_gen: v6e
topology: v6e:2x2x1
jax: 0.10.0
libtpu: 0.0.40
codegen_flags: <defaults>
</compile_context>

<pallas_src>
import jax
import jax.numpy as jnp
from jax.experimental import pallas as pl
from jax.experimental.pallas import tpu as pltpu


def _round_up(n, m):
    return ((n + m - 1) // m) * m


def residual_conv1x1_kernel(x_ref, w_ref, b_ref, o_ref):
    """o = W @ x + b + x on one (Bb, C, TN) slab of pixels.

    x_ref, o_ref: (Bb, C, TN)  TN pixels of Bb batch rows (lanes = pixels)
    w_ref:        (C, C)       conv weight, native PyTorch (C_out, C_in) layout
    b_ref:        (C, 1)       conv bias (broadcast across lanes)
    """
    out_dtype = o_ref.dtype
    # Epilogue dtype: keep the bias+residual add in bf16 for bf16 tensors
    # (native VPU on v6e/v7x, halves vreg traffic); f32 otherwise.
    epi_dtype = jnp.float32 if out_dtype == jnp.float32 else out_dtype
    w = w_ref[...]
    b = b_ref[...].astype(epi_dtype)
    for bb in range(x_ref.shape[0]):                      # static, unrolled
        x = x_ref[bb]                                     # (C, TN)
        # PyTorch Conv2d 1x1: y[co, p] = sum_ci W[co, ci] * x[ci, p] + b[co].
        # W is used untransposed; pixels fill the MXU N dimension (lane-dense).
        y = jnp.dot(w, x, preferred_element_type=jnp.float32)
        o_ref[bb] = (y.astype(epi_dtype) + b + x.astype(epi_dtype)).astype(out_dtype)


def _vmem_capacity_bytes():
    try:
        cap = int(getattr(pltpu.get_tpu_info(), "vmem_capacity_bytes", 0))
        if cap > 0:
            return cap
    except Exception:
        pass
    return 64 << 20        # conservative fallback (v7x per-TC VMEM)


def _pick_tiles(B, C, HW, itemsize, w_itemsize):
    """Pick (Bb, TN, vmem_limit_bytes) for the (Bb, C, TN) pixel slabs."""
    hw_pad = _round_up(max(HW, 1), 128)
    m = hw_pad // 128
    c_pad = _round_up(C, 8)

    vmem_cap = _vmem_capacity_bytes()
    # Generation-aware budget for our buffers (~70% of physical VMEM):
    # v5e/v6e 128 MiB -> ~90 MiB, v7x 64 MiB -> ~45 MiB.
    budget = int(vmem_cap * 0.70)

    # Resident (single-buffered) weight + padded (C,1) bias.
    fixed = c_pad * c_pad * w_itemsize + c_pad * 128 * 4

    def fits(bb, tn):
        # double-buffered input + output slabs
        return fixed + 4 * bb * c_pad * tn * itemsize <= budget

    # Candidate lane tiles: multiples of 128 that evenly divide hw_pad, so
    # every tile is full (no partial tail -> unmasked stores, full DMAs).
    divs = [128 * d for d in range(1, m + 1) if m % d == 0]

    tn = 128
    for t in reversed(divs):                      # largest first
        if fits(1, t):
            tn = t
            break

    # Keep >= MIN_STEPS independent grid steps so both v7x TensorCores (and
    # the software pipeline) stay busy; no-op for shapes with many steps.
    MIN_STEPS = 4
    while B * (hw_pad // tn) < MIN_STEPS:
        smaller = [t for t in divs if t < tn]
        if not smaller:
            break
        tn = smaller[-1]

    # When one tile already covers the whole pixel row, fold a small batch
    # sub-block into the tile to amortize the ~0.35 us per-grid-step overhead
    # on tiny-slab layers (deep UNet levels).
    bb = 1
    if hw_pad // tn == 1:
        while (bb * 2 <= min(B, 8)
               and fits(bb * 2, tn)
               and -(-B // (bb * 2)) >= MIN_STEPS):
            bb *= 2

    required = fixed + 4 * bb * c_pad * tn * itemsize
    vmem_limit = int(min(vmem_cap * 0.85, required + (16 << 20)))
    vmem_limit = max(vmem_limit, 32 << 20)
    vmem_limit = int(min(vmem_limit, vmem_cap * 0.9))
    return bb, tn, vmem_limit


def residual_forward(x_nchw, weight, bias):
    """Residual(Conv2d(C, C, 1)) forward.  x_nchw: (B, C, H, W), kept in NCHW.

    weight: (C_out, C_in)  (PyTorch (C, C, 1, 1) squeezed), bias: (C,).
    """
    B, C, H, W = x_nchw.shape
    HW = H * W
    x3 = x_nchw.reshape(B, C, HW)                 # free reshape, no relayout

    if x3.dtype == jnp.bfloat16 and weight.dtype == jnp.float32:
        # bf16 activations: match the weight so the dot runs at MXU bf16 rate
        # (the f32 accumulator keeps accuracy), and halve the resident weight.
        weight = weight.astype(jnp.bfloat16)
    # TODO(synk): for f32 activations with very large C (>= ~512) on v5e the
    # kernel crosses into MXU-bound territory; casting weight AND x to bf16
    # (keeping the f32 accumulator) recovers full MXU rate there.

    b2 = bias.reshape(C, 1)

    bb, tn, vmem_limit = _pick_tiles(B, C, HW, x3.dtype.itemsize,
                                     weight.dtype.itemsize)
    grid = (pl.cdiv(B, bb), pl.cdiv(HW, tn))      # tails masked by Pallas

    const_idx = lambda i, j: (0, 0)
    out3 = pl.pallas_call(
        residual_conv1x1_kernel,
        out_shape=jax.ShapeDtypeStruct((B, C, HW), x3.dtype),
        grid_spec=pltpu.PrefetchScalarGridSpec(
            num_scalar_prefetch=0,
            grid=grid,
            in_specs=[
                pl.BlockSpec((bb, C, tn), lambda i, j: (i, 0, j)),
                # Weight / bias: constant index_map + single buffer -> held
                # resident across the whole grid, maximum VMEM left for the
                # double-buffered x / o slabs.
                pl.BlockSpec((C, C), const_idx, pipeline_mode=pl.Buffered(1)),
                pl.BlockSpec((C, 1), const_idx, pipeline_mode=pl.Buffered(1)),
            ],
            out_specs=pl.BlockSpec((bb, C, tn), lambda i, j: (i, 0, j)),
        ),
        compiler_params=pltpu.CompilerParams(
            # Both grid axes independent -> megacore / v7x 2-TC sharding.
            dimension_semantics=("parallel", "parallel"),
            vmem_limit_bytes=vmem_limit,
        ),
        # TODO(synk): callers that can donate x should add
        # input_output_aliases={0: 0} to drop the extra (B,C,H,W) HBM alloc.
    )(x3, weight, b2)

    return out3.reshape(B, C, H, W)


if __name__ == "__main__":
    key = jax.random.PRNGKey(0)
    kx, kw, kb = jax.random.split(key, 3)

    B, C, H, W = 2, 4, 16, 16
    x = jax.random.normal(kx, (B, C, H, W), dtype=jnp.float32)

    # Deterministic params for fn = Conv2d(C, C, 1):
    # PyTorch weight (C_out, C_in, 1, 1) squeezed to (C_out, C_in), bias (C,).
    fan_in = C
    bound = 1.0 / (fan_in ** 0.5)
    weight = jax.random.uniform(kw, (C, C), jnp.float32, -bound, bound)
    bias = jax.random.uniform(kb, (C,), jnp.float32, -bound, bound)

    out = jax.block_until_ready(residual_forward(x, weight, bias))

    # Plain-JAX reference of fn(x) + x, computed directly in NCHW.
    ref = jnp.einsum("oc,bchw->bohw", weight, x) + bias.reshape(1, C, 1, 1) + x
    assert out.shape == (B, C, H, W)
    assert jnp.allclose(out, ref, atol=1e-5, rtol=1e-5)

    print("KERNEL_OK")
</pallas_src>

<mosaic_0001>
module attributes {stable_mosaic.version = 11 : i64} {
  func.func @residual_conv1x1_kernel(%arg0: i32, %arg1: i32, %arg2: memref<1x4x128xf32, #tpu.memory_space<vmem>>, %arg3: memref<4x4xf32, #tpu.memory_space<vmem>>, %arg4: memref<4x1xf32, #tpu.memory_space<vmem>>, %arg5: memref<1x4x128xf32, #tpu.memory_space<vmem>>) attributes {dimension_semantics = [#tpu.dimension_semantics<parallel>, #tpu.dimension_semantics<parallel>], iteration_bounds = array<i64: 2, 2>, scalar_prefetch = 0 : i64, scratch_operands = 0 : i64, tpu.core_type = #tpu.core_type<tc>, window_params = [{transform_indices = @transform_0, window_bounds = array<i64: 1, 4, 128>}, {pipeline_mode = #tpu.pipeline_mode<synchronous>, transform_indices = @transform_1, window_bounds = array<i64: 4, 4>}, {pipeline_mode = #tpu.pipeline_mode<synchronous>, transform_indices = @transform_2, window_bounds = array<i64: 4, 1>}, {transform_indices = @transform_3, window_bounds = array<i64: 1, 4, 128>}]} {
    %c0 = arith.constant 0 : index
    %c0_0 = arith.constant 0 : index
    %0 = vector.load %arg3[%c0, %c0_0] : memref<4x4xf32, #tpu.memory_space<vmem>>, vector<4x4xf32>
    %c0_1 = arith.constant 0 : index
    %c0_2 = arith.constant 0 : index
    %1 = vector.load %arg4[%c0_1, %c0_2] : memref<4x1xf32, #tpu.memory_space<vmem>>, vector<4x1xf32>
    %c0_3 = arith.constant 0 : index
    %c0_4 = arith.constant 0 : index
    %c0_5 = arith.constant 0 : index
    %2 = vector.load %arg2[%c0_3, %c0_4, %c0_5] : memref<1x4x128xf32, #tpu.memory_space<vmem>>, vector<1x4x128xf32>
    %3 = vector.shape_cast %2 : vector<1x4x128xf32> to vector<4x128xf32>
    %cst = arith.constant dense<0.000000e+00> : vector<4x128xf32>
    %4 = tpu.matmul %0, %3, %cst {dimension_numbers = #tpu.dot_dimension_numbers<[1], [0], [0], [1], [0, 0, 1, 1], [], []>} : vector<4x4xf32>, vector<4x128xf32>, vector<4x128xf32> -> vector<4x128xf32>
    %5 = vector.broadcast %1 : vector<4x1xf32> to vector<4x128xf32>
    %6 = arith.addf %4, %5 : vector<4x128xf32>
    %7 = arith.addf %6, %3 : vector<4x128xf32>
    %c0_6 = arith.constant 0 : index
    %c0_7 = arith.constant 0 : index
    %c0_8 = arith.constant 0 : index
    %8 = vector.load %arg5[%c0_6, %c0_7, %c0_8] : memref<1x4x128xf32, #tpu.memory_space<vmem>>, vector<1x4x128xf32>
    %9 = vector.shape_cast %8 : vector<1x4x128xf32> to vector<4x128xf32>
    %10 = vector.shape_cast %7 : vector<4x128xf32> to vector<1x4x128xf32>
    tpu.vector_store %arg5[%c0_6, %c0_7, %c0_8], %10 {strides = array<i32>} : memref<1x4x128xf32, #tpu.memory_space<vmem>>, vector<1x4x128xf32>,
    return
  }
  func.func @transform_0(%arg0: i32, %arg1: i32) -> (i32, i32, i32) {
    %c0_i32 = arith.constant 0 : i32
    %c0_i32_0 = arith.constant 0 : i32
    return %arg0, %c0_i32, %arg1 : i32, i32, i32
  }
  func.func @transform_1(%arg0: i32, %arg1: i32) -> (i32, i32) {
    %c0_i32 = arith.constant 0 : i32
    %c0_i32_0 = arith.constant 0 : i32
    %c0_i32_1 = arith.constant 0 : i32
    return %c0_i32, %c0_i32_0 : i32, i32
  }
  func.func @transform_2(%arg0: i32, %arg1: i32) -> (i32, i32) {
    %c0_i32 = arith.constant 0 : i32
    %c0_i32_0 = arith.constant 0 : i32
    %c0_i32_1 = arith.constant 0 : i32
    return %c0_i32, %c0_i32_0 : i32, i32
  }
  func.func @transform_3(%arg0: i32, %arg1: i32) -> (i32, i32, i32) {
    %c0_i32 = arith.constant 0 : i32
    %c0_i32_0 = arith.constant 0 : i32
    return %arg0, %c0_i32, %arg1 : i32, i32, i32
  }
}

</mosaic_0001>

<bundles_post_ra>
// kernel: tpu_custom_call.1
= control target key start
LH: loop header
LB: loop body
LE: loop exit
PB: predicated region body
PF: predicated region fallthrough
CT: control target
= control target key end

     0   :  { %8 = vsyncpa [#allocation3], 0  ;;  %s812_s0 = inlined_call_operand.hbm [shape: f32[2,4,256], index: 0, kind: input, shape index: {}]   ;;  %s813_s1 = inlined_call_operand.vmem [shape: f32[4,4], index: 1, kind: input, shape index: {}]   ;;  %s814_s2 = inlined_call_operand.vmem [shape: f32[4,1], index: 2, kind: input, shape index: {}]   ;;  %s815_s3 = inlined_call_operand.hbm [shape: f32[2,4,256], index: 3, kind: output, shape index: {}]  }
   0x1   :  { %10 = vsyncpa [#allocation3 + $0x1], 0 }
   0x2   :  { %11 = vsyncpa [#allocation4], 0 }
   0x3   :  { %13 = vsyncpa [#allocation4 + $0x1], 0  ;;  %s650_s12 = smov 0   ;;  %s652_s13 = smov 0  }
   0x4   :  { %s654_s14 = smov 0   ;;  %s656_s15 = smov 0  }
   0x5   :  { %s658_s16 = smov 0   ;;  %s660_s17 = smov 0  }
   0x6   :  { %s662_s18 = smov 0   ;;  %s664_s19 = smov 0  }
   0x7 LB: > { %s393_s20 = sadd.s32 4294967295, %s623_s19   ;;  %s394_s21 = sadd.s32 4294967294, %s623_s19   ;;  %s623_s19 = sphi %s664_s19, %s19_s19   ;;  %s619_s18 = sphi %s662_s18, %s831_s18   ;;  %s615_s17 = sphi %s660_s17, %s830_s17   ;;  %s611_s16 = sphi %s658_s16, %s829_s16   ;;  %s607_s15 = sphi %s656_s15, %s828_s15   ;;  %s603_s14 = sphi %s654_s14, %s827_s14   ;;  %s599_s13 = sphi %s652_s13, %s826_s13   ;;  %s595_s12 = sphi %s650_s12, %s825_s12  }
   0x8   : > { %s28_s22 = sadd.s32 1, %s615_s17  ;;  %s31_s23 = sadd.s32 1, %s619_s18 }
   0x9   : > { %p29_p0 = scmp.ge.s32.totalorder %s28_s22, 2  ;;  %s40_s24 = sadd.s32 1, %s603_s14 }
   0xa   : > { %p47_p1 = scmp.ne.s32.totalorder %s603_s14, %s599_s13  ;;  %p48_p2 = scmp.eq.s32.totalorder %s623_s19, 0 }
   0xb   : > { %s833_s22 = smov (%p29_p0, %s28_s22), 0  ;;  %s835_s23 = smov (!%p29_p0, %s31_s23), %s619_s18 }
   0xc   : > { %s36_s25 = ssub.s32 %s615_s17, %s833_s22  ;;  %p703_p3 = por %p48_p2, %p47_p1 }
   0xd   : > { %p33_p4 = scmp.ge.s32.totalorder %s835_s23, 2  ;;  %p53_p5 = scmp.ne.s32.totalorder %s599_s13, %s595_s12 }
   0xe   : > { %p54_p6 = scmp.eq.s32.totalorder %s393_s20, 0  ;;  %p121_p7 = scmp.eq.s32.totalorder %s393_s20, 3 }
   0xf   : > { %s837_s23 = smov (%p33_p4, %s835_s23), 0  ;;  %p127_p10 = scmp.eq.s32.totalorder %s394_s21, 3 }
  0x10   : > { %818 = sst [smem:[#allocation8_spill]] %s837_s23  ;;  %p711_p8 = por %p54_p6, %p53_p5 }
  0x11   : > { %p715_p9 = por %p121_p7, %p47_p1  ;;  %s35_s29 = ssub.s32 %s619_s18, %s837_s23 }
  0x12   : > { %s37_s30 = sor.u32 %s36_s25, %s35_s29  ;;  %p721_p12 = por %p127_p10, %p53_p5 }
  0x13   : > { %p38_p11 = scmp.eq.s32.totalorder %s37_s30, 0  ;;  %p429_p13 = scmp.lt.s32.totalorder %s623_s19, 4 }
  0x14   : > { %s821_s4 = scalar_select %p721_p12, 1, 0 }
  0x15   : > { %s153_s5 = sand.u32 1, %s603_s14   ;;  %s398_s8 = sshll.u32 %s619_s18, 1 }
  0x16   : > { %s728_s6 = scalar_select %p38_p11, %s603_s14, %s40_s24  }
  0x17   : > { %s397_s7 = sshll.u32 %s153_s5, 2  ;;  %s162_s9 = sadd.s32 %s615_s17, %s398_s8 }
  0x18   : > { %s157_s10 = scalar_lea.vmem [#allocation2], %s397_s7  ;;  %s399_s20 = sshll.u32 %s162_s9, 6 }
  0x19   : > { %s166_s11 = sshll.u32 %s157_s10, 4  ;;  %s164_s25 = scalar_lea.hbm %s812_s0, %s399_s20  ;;  %s167_s11 = int_to_ptr.vmem [resolvable:$true] %s166_s11 }
  0x1a   : > { %p737_p0 = pnand %p429_p13, %p703_p3  ;;  %p400_p1 = scmp.ge.s32.totalorder %s623_s19, 1 }
  0x1b   : > { %p171_p2 = scmp.lt.s32.totalorder %s623_s19, 5  ;;  %s154_s24 = scalar_lea.sflag [#allocation3], %s153_s5 }
  0x1c   : > { %p501_p4 = pneg %p737_p0  ;;  %s512_s30 = scalar_lea.vmem %s167_s11, 64 }
  0x1d   : > { %p513_p5 = scmp.ne.s32.totalorder %s167_s11, %s512_s30  ;;  %s625_s7 = smov [#allocation2]  }
  0x1e   : > { %s517_s8 = sshll.u32 %s625_s7, 4  ;;  %s518_s8 = int_to_ptr.vmem [resolvable:$false] %s517_s8 }
  0x1f   : > { %p515_p6 = pnand %p513_p5, %p501_p4  ;;  %s519_s23 = scalar_lea.vmem %s518_s8, 128 }
  0x20   : > { %p520_p10 = scmp.lt.s32.totalorder %s167_s11, %s518_s8  ;;  %p521_p11 = scmp.lt.s32.totalorder %s519_s23, %s512_s30 }
  0x21   : > { %p516_p7 = pneg %p515_p6 }
  0x22   : > { %p522_p3 = por %p521_p11, %p520_p10 }
  0x24   : > { %p523_p13 = pnand %p522_p3, %p516_p7 }
  0x26   : > { %526 = shalt.err (!%p523_p13)
}
  0x27   : > { %424 = dma.hbm_to_vmem [thread:$0]  (!%p737_p0), %s164_s25, 64, %s167_s11, %s154_s24  }
  0x28   : > { %p172_p12 = pnand %p400_p1, %p171_p2 }
  0x29   : > { %s752_s26 = sand.u32 (!%p172_p12), 1, %s599_s13  }
  0x2a   : > { %175 = sbr.rel (%p172_p12) target bundleno = 261 (0x105), region = 32  ;;  %s401_s5 = sshll.u32 (!%p172_p12), %s752_s26, 2 }
  0x2b   : > { %s178_s9 = scalar_lea.sflag (!%p172_p12), [#allocation3], %s752_s26  ;;  %s181_s10 = scalar_lea.vmem (!%p172_p12), [#allocation2], %s401_s5 }
  0x2f   : > { %586 = dma.done.wait (%p711_p8), %s178_s9, 64  }
  0x30   : > { %588 = vsyncadd (%p711_p8), %s178_s9, 4294967232  ;;  %v626_v0 = vmov 0.0   ;;  %vm627_vm0 = vmmov 0   ;;  %v628_v1 = vmov 0   ;;  %vm216_vm1 = vcmask 1043456   ;;  %s406_s27 = sshll.u32 %s611_s16, 1 }
  0x31   : > { %412 = vmatprep.subr.mxu0 %v626_v0  ;;  %414 = vmatprep.mubr.msk.f32.mxu0 %vm627_vm0, %v626_v0  ;;  %vm212_vm2 = vcmask 31744   ;;  %v206_v2 = vld [vmem:[%s181_s10] sm:$0xf]  ;;  %s304_s29 = sadd.s32 %s607_s15, %s406_s27  ;;  %s203_s30 = scalar_lea.vmem [#allocation5], %s401_s5 }
  0x32   : > { %498 = vset.pattern.permute.xlu0 %v628_v1  ;;  %v204_v3 = vld [vmem:[%s813_s1] sm:$0xf]  ;;  %413 = vmatpush3.msk.msra.mxu0 %vm216_vm1, %v206_v2  ;;  %s407_s24 = sshll.u32 %s304_s29, 6  ;;  %s308_s7 = sshll.u32 %s203_s30, 4  ;;  %s309_s7 = int_to_ptr.vmem [resolvable:$true] %s308_s7 }
  0x33   : > { %v205_v4 = vld [vmem:[%s814_s2] sm:$0xf]  ;;  %415 = vmatmul.mubr.msk.f32.vlgmr.msra.gmra.mxu0 %vm212_vm2, %v204_v3  ;;  %s306_s9 = scalar_lea.hbm %s815_s3, %s407_s24  ;;  %s293_s10 = scalar_lea.sflag [#allocation4], %s752_s26 }
  0x34   : > { %209 = vperm.xlu0 %498, %v205_v4   ;;  %s527_s11 = scalar_lea.vmem %s309_s7, 64  ;;  %s629_s15 = smov [#allocation5]  }
  0x35   : > { %p528_p8 = scmp.ne.s32.totalorder %s309_s7, %s527_s11  ;;  %s531_s16 = sshll.u32 %s629_s15, 4  ;;  %s532_s16 = int_to_ptr.vmem [resolvable:$false] %s531_s16 }
  0x36   : > { %s533_s5 = scalar_lea.vmem %s532_s16, 128  ;;  %p534_p1 = scmp.lt.s32.totalorder %s309_s7, %s532_s16 }
  0x37   : > { %p529_p12 = pnand %p528_p8, %p715_p9  ;;  %p535_p2 = scmp.lt.s32.totalorder %s533_s5, %s527_s11 }
  0x39   : > { %p530_p0 = pneg %p529_p12  ;;  %p536_p4 = por %p535_p2, %p534_p1 }
  0x3b   : > { %p537_p5 = pnand %p536_p4, %p530_p0 }
  0xaf   : > { %v210_v5 = vpop.permute.xlu0 %209 }
  0xf3   : > { %v286_v6 = vpop.f32.mrf.mxu0 }
  0xf4   : > { %v287_v7 = vadd.f32 %v286_v6, %v210_v5 }
  0xf5   : > { %v416_v8 = vpop.f32.mrf.mxu0 }
  0xf6   : > { %v290_v9 = vadd.f32 %v287_v7, %v206_v2 }
  0xf8   : > { %291 = vst [vmem:[%s203_s30] sm:$0xf] %v290_v9 }
  0xf9   : > { %540 = shalt.err (!%p537_p5)
}
  0xfa   : > { %s541_s20 = scalar_lea.hbm %s306_s9, 64  ;;  %s545_s25 = scalar_lea.hbm %s815_s3, 256 }
  0xfb   : > { %p542_p6 = scmp.ne.s32.totalorder %s306_s9, %s541_s20  ;;  %p546_p11 = scmp.lt.s32.totalorder %s306_s9, %s815_s3 }
  0xfc   : > { %p547_p3 = scmp.lt.s32.totalorder %s545_s25, %s541_s20 }
  0xfd   : > { %p543_p7 = pnand %p542_p6, %p715_p9 }
  0xfe   : > { %p548_p13 = por %p547_p3, %p546_p11 }
  0xff   : > { %p544_p10 = pneg %p543_p7 }
 0x101   : > { %p549_p8 = pnand %p548_p13, %p544_p10 }
 0x103   : > { %552 = shalt.err (!%p549_p8)
}
 0x104   : > { %419 = dma.vmem_to_hbm [thread:$0]  (%p715_p9), %s309_s7, 64, %s306_s9, %s293_s10  }
 0x105 PF: > { %p430_p12 = scmp.ge.s32.totalorder %s623_s19, 2  ;;  %s320_s24 = sand.u32 1, %s595_s12  }
 0x106   : > { %p823_p0 = scmp.ne.s32.totalorder %s821_s4, 0  ;;  %s321_s30 = scalar_lea.sflag [#allocation4], %s320_s24 }
 0x108   : > { %p426_p1 = pnand %p430_p12, %p823_p0 }
 0x10a   : > { %p427_p2 = pneg %p426_p1 }
 0x10c   : > { %590 = dma.done.wait (%p427_p2), %s321_s30, 64  }
 0x10d   : > { %592 = vsyncadd (%p427_p2), %s321_s30, 4294967232  ;;  %s19_s19 = sadd.s32 1, %s623_s19   ;;  %s824_s28 = sld [smem:[#allocation8_spill]] }
 0x10e   : > { %p16_p4 = scmp.ge.s32.totalorder %s19_s19, 6   ;;  %s825_s12 = smov %s599_s13 }
 0x10f   : > { %s826_s13 = smov %s603_s14  ;;  %s827_s14 = smov %s728_s6 }
 0x110   : > { %s828_s15 = smov %s615_s17  ;;  %s829_s16 = smov %s619_s18 }
 0x111   : > { %s830_s17 = smov %s833_s22  ;;  %18 = sbr.rel (!%p16_p4) target bundleno = 7 (0x7), region = 77 }
 0x113   : > { %s831_s18 = smov %s824_s28 }
 0x116   :  { %326 = vsyncpa [#allocation3], 1 }
 0x117   :  { %328 = vsyncpa [#allocation3 + $0x1], 1 }
 0x118   :  { %329 = vsyncpa [#allocation4], 1 }
 0x119   :  { %331 = vsyncpa [#allocation4 + $0x1], 1 }

</bundles_post_ra>
